<compile_context>
chip_gen: v7x
topology: tpu7x:2x2x1
jax: 0.10.0
libtpu: 0.0.40
codegen_flags: <defaults>
</compile_context>

<pallas_src>
import math
import numpy as np
import jax
import jax.numpy as jnp
from jax.experimental import pallas as pl
from jax.experimental.pallas import tpu as pltpu


def make_pe_table(dim, max_len):
    """Deterministic sinusoidal table, exactly matching the torch __init__."""
    mid_pos = max_len // 2
    position = np.arange(0, max_len, dtype=np.float32)[:, None] - mid_pos
    div_term = np.exp(
        np.arange(0, dim, 2, dtype=np.float32) * -(math.log(10000.0) / dim)
    )
    pe = np.zeros((max_len, dim), dtype=np.float32)
    pe[:, 0::2] = np.sin(position * div_term)
    pe[:, 1::2] = np.cos(position * div_term)
    return jnp.asarray(pe), mid_pos


def _choose_tl(length, dim, itemsize, seq_block=None, budget_bytes=12 << 20):
    """Rows of the sequence tile per grid step.

    Budget covers 6 buffers of (tl, dim) in emb's dtype: double-buffered emb
    input + output (pipeline) + double-buffered pe scratch.  Kept <= ~12 MiB so
    v7x's 64 MiB VMEM has headroom; >=512-row tiles already sit near the HBM
    roofline, so larger tiles buy nothing.
    """
    if seq_block is not None:
        tl = min(int(seq_block), length)
    else:
        per_row = 6 * dim * itemsize
        max_rows = max(8, budget_bytes // per_row)
        if length <= max_rows:
            tl = length
        else:
            div = max(
                (t for t in range(8, int(max_rows) + 1, 8) if length % t == 0),
                default=None,
            )
            cdiv_tl = int(max_rows) - int(max_rows) % 8
            # Prefer an exact divisor unless it is much smaller than the
            # budget allows; otherwise cdiv grid (partial last block).
            tl = div if (div is not None and div * 2 > cdiv_tl) else cdiv_tl
    if tl != length and tl % 8:
        tl = max(8, tl - tl % 8)
    return tl


def _make_kernel(mid_pos, max_len, tl):
    def kernel(shift_ref, emb_ref, pe_hbm, out_ref, pe_buf, sem):
        # shift_ref : SMEM (bsz,) int32        (scalar-prefetched)
        # emb_ref   : VMEM (tl, dim) tile      (batch dim squeezed)
        # pe_hbm    : HBM  (max_len, dim) raw ref (memory_space=pl.ANY)
        # out_ref   : VMEM (tl, dim)
        # pe_buf    : VMEM (2, tl, dim) double buffer, emb dtype
        # sem       : DMA semaphores (2,)
        b = pl.program_id(0)
        l = pl.program_id(1)
        num_l = pl.num_programs(1)
        slot = l % 2

        def start_fetch(seq_tile, dst_slot):
            start = mid_pos + seq_tile * tl - shift_ref[b]
            # Clamp to a valid window: DMAs are not bounds-checked on TPU and
            # out-of-range shift would raise in PyTorch anyway (documented).
            start = jnp.clip(start, 0, max_len - tl)
            pltpu.make_async_copy(
                pe_hbm.at[pl.ds(start, tl), :],
                pe_buf.at[dst_slot],
                sem.at[dst_slot],
            ).start()

        # First tile of a batch row: nothing prefetched it yet.  Exposed once
        # per row; safe regardless of how megacore splits the batch axis.
        @pl.when(l == 0)
        def _():
            start_fetch(0, 0)

        # Prefetch the next sequence tile of the same batch row into the other
        # slot; hidden behind this step's add + the pipeline's emb/out DMAs.
        @pl.when(l + 1 < num_l)
        def _():
            start_fetch(l + 1, 1 - slot)

        # Wait for this step's pe window (descriptor only needs matching size).
        pltpu.make_async_copy(
            pe_hbm.at[pl.ds(0, tl), :], pe_buf.at[slot], sem.at[slot]
        ).wait()

        out_ref[...] = (emb_ref[...] + pe_buf[slot]).astype(out_ref.dtype)

    return kernel


def relative_positional_encoding(emb, shift, pe, mid_pos, *, seq_block=None):
    """out[b, t, :] = emb[b, t, :] + pe[mid_pos + t - shift[b], :]."""
    bsz, length, dim = emb.shape
    max_len = pe.shape[0]

    # Keep the pe HBM stream in emb's dtype (one less f32 stream for bf16).
    pe = pe.astype(emb.dtype)

    # Lane-dense stores: pad dim up to a multiple of 128 (layout plumbing).
    pad = (-dim) % 128
    if pad:
        emb = jnp.pad(emb, ((0, 0), (0, 0), (0, pad)))
        pe = jnp.pad(pe, ((0, 0), (0, pad)))
    dim_p = dim + pad

    # v7x megacore: the batch axis carries the "parallel" grid dim.  With a
    # single batch row, split it into two pseudo-rows (the index offset of the
    # second half folds into its shift) so both TensorCores get work.
    split = bsz == 1 and length >= 16 and length % 2 == 0
    if split:
        half = length // 2
        emb = emb.reshape(2, half, dim_p)
        shift = jnp.stack([shift[0], shift[0] - half])
        bsz, length = 2, half

    itemsize = jnp.dtype(emb.dtype).itemsize
    tl = _choose_tl(length, dim_p, itemsize, seq_block=seq_block)
    assert tl <= max_len, (
        f"sequence tile ({tl}) larger than pe table ({max_len}); increase max_len"
    )
    num_l = pl.cdiv(length, tl)
    grid = (bsz, num_l)

    # 2x emb in + 2x out (pipeline double-buffers) + 2x pe scratch, + headroom.
    tile_bytes = tl * dim_p * itemsize
    vmem_limit = int(min(max(6 * tile_bytes + (2 << 20), 4 << 20), 32 << 20))

    kernel = _make_kernel(mid_pos, max_len, tl)
    shift = shift.astype(jnp.int32)

    out = pl.pallas_call(
        kernel,
        out_shape=jax.ShapeDtypeStruct((bsz, length, dim_p), emb.dtype),
        grid_spec=pltpu.PrefetchScalarGridSpec(
            num_scalar_prefetch=1,  # shift -> SMEM
            grid=grid,
            in_specs=[
                pl.BlockSpec((None, tl, dim_p), lambda b, l, s: (b, l, 0)),
                pl.BlockSpec(memory_space=pl.ANY),  # pe stays in HBM
            ],
            out_specs=pl.BlockSpec((None, tl, dim_p), lambda b, l, s: (b, l, 0)),
            scratch_shapes=[
                pltpu.VMEM((2, tl, dim_p), emb.dtype),  # pe window double buffer
                pltpu.SemaphoreType.DMA((2,)),
            ],
        ),
        compiler_params=pltpu.CompilerParams(
            dimension_semantics=("parallel", "arbitrary"),
            vmem_limit_bytes=vmem_limit,
        ),
    )(shift, emb, pe)

    if split:
        out = out.reshape(1, 2 * length, dim_p)
    if pad:
        out = out[..., :dim]
    return out


if __name__ == "__main__":
    # Small, module-consistent shapes; dim multiple of 128 (lane-dense stores).
    bsz, length, dim, max_len = 2, 256, 128, 1024

    pe, mid_pos = make_pe_table(dim, max_len)

    key = jax.random.PRNGKey(0)
    emb = jax.random.normal(key, (bsz, length, dim), dtype=jnp.float32)
    shift = jnp.array([3, -2], dtype=jnp.int32)  # |shift| small: indices stay in-table

    # seq_block=64 -> 4 sequence tiles per batch row, exercising the
    # cross-step pe-window prefetch (double-buffered DMA) path.
    out = relative_positional_encoding(emb, shift, pe, mid_pos, seq_block=64)
    out = jax.block_until_ready(out)

    # Pure-JAX reference of the PyTorch forward.
    index = jnp.arange(mid_pos, mid_pos + length)[None, :] - shift[:, None]
    ref = emb + pe[index]
    assert out.shape == (bsz, length, dim)
    assert jnp.allclose(out, ref, atol=1e-6, rtol=1e-6)

    print("KERNEL_OK")
</pallas_src>

<mosaic_0001>
module attributes {stable_mosaic.version = 11 : i64} {
  func.func @kernel(%arg0: i32, %arg1: i32, %arg2: memref<2xi32, #tpu.memory_space<smem>>, %arg3: memref<1x64x128xf32, #tpu.memory_space<vmem>>, %arg4: memref<1024x128xf32, #tpu.memory_space<any>>, %arg5: memref<1x64x128xf32, #tpu.memory_space<vmem>>, %arg6: memref<2x64x128xf32, #tpu.memory_space<vmem>>, %arg7: memref<2x!tpu.dma_semaphore, #tpu.memory_space<semaphore_mem>>) attributes {dimension_semantics = [#tpu.dimension_semantics<parallel>, #tpu.dimension_semantics<arbitrary>], iteration_bounds = array<i64: 2, 4>, scalar_prefetch = 1 : i64, scratch_operands = 2 : i64, tpu.core_type = #tpu.core_type<tc>, window_params = [{transform_indices = @transform_0, window_bounds = array<i64: 1, 64, 128>}, {}, {transform_indices = @transform_2, window_bounds = array<i64: 1, 64, 128>}]} {
    %c2_i32 = arith.constant 2 : i32
    %c0_i32 = arith.constant 0 : i32
    %0 = arith.cmpi eq, %c2_i32, %c0_i32 : i32
    %c1_i32 = arith.constant 1 : i32
    %1 = arith.select %0, %c1_i32, %c2_i32 : i32
    %2 = arith.remsi %arg1, %1 : i32
    %c0_i32_0 = arith.constant 0 : i32
    %3 = arith.cmpi ne, %2, %c0_i32_0 : i32
    %c0_i32_1 = arith.constant 0 : i32
    %4 = arith.cmpi slt, %2, %c0_i32_1 : i32
    %c0_i32_2 = arith.constant 0 : i32
    %5 = arith.cmpi slt, %1, %c0_i32_2 : i32
    %6 = arith.xori %4, %5 : i1
    %7 = arith.andi %6, %3 : i1
    %8 = arith.addi %2, %1 : i32
    %9 = arith.select %7, %8, %2 : i32
    %c0_i32_3 = arith.constant 0 : i32
    %10 = arith.cmpi eq, %arg1, %c0_i32_3 : i32
    %11 = arith.extui %10 : i1 to i32
    %c0_i32_4 = arith.constant 0 : i32
    %12 = arith.cmpi ne, %11, %c0_i32_4 : i32
    scf.if %12 {
      %31 = arith.index_cast %arg0 : i32 to index
      %32 = memref.load %arg2[%31] : memref<2xi32, #tpu.memory_space<smem>>
      %c512_i32 = arith.constant 512 : i32
      %33 = arith.subi %c512_i32, %32 : i32
      %c0_i32_18 = arith.constant 0 : i32
      %c960_i32 = arith.constant 960 : i32
      %34 = arith.maxsi %c0_i32_18, %33 : i32
      %35 = arith.minsi %c960_i32, %34 : i32
      %c0_i32_19 = arith.constant 0 : i32
      %c0_i32_20 = arith.constant 0 : i32
      %c0_i32_21 = arith.constant 0 : i32
      %36 = tpu.memref_slice %arg4[%35, %c0_i32_21] : memref<1024x128xf32, #tpu.memory_space<any>> -> memref<64x128xf32, #tpu.memory_space<any>>
      %c0_i32_22 = arith.constant 0 : i32
      %c0_i32_23 = arith.constant 0 : i32
      %37 = tpu.memref_slice %arg6[%c0_i32_19, %c0_i32_22, %c0_i32_23] : memref<2x64x128xf32, #tpu.memory_space<vmem>> -> memref<1x64x128xf32, #tpu.memory_space<vmem>>
      %38 = tpu.memref_squeeze %37 : memref<1x64x128xf32, #tpu.memory_space<vmem>> -> memref<64x128xf32, #tpu.memory_space<vmem>>
      %39 = tpu.memref_slice %arg7[%c0_i32_20] : memref<2x!tpu.dma_semaphore, #tpu.memory_space<semaphore_mem>> -> memref<1x!tpu.dma_semaphore, #tpu.memory_space<semaphore_mem>>
      %40 = tpu.memref_squeeze %39 : memref<1x!tpu.dma_semaphore, #tpu.memory_space<semaphore_mem>> -> memref<!tpu.dma_semaphore, #tpu.memory_space<semaphore_mem>>
      tpu.enqueue_dma source(%36 : memref<64x128xf32, #tpu.memory_space<any>>) target(%38 : memref<64x128xf32, #tpu.memory_space<vmem>>) target_semaphore(%40 : memref<!tpu.dma_semaphore, #tpu.memory_space<semaphore_mem>>)
    } else {
    }
    %c1_i32_5 = arith.constant 1 : i32
    %13 = arith.addi %arg1, %c1_i32_5 : i32
    %c4_i32 = arith.constant 4 : i32
    %14 = arith.cmpi slt, %13, %c4_i32 : i32
    %15 = arith.extui %14 : i1 to i32
    %c0_i32_6 = arith.constant 0 : i32
    %16 = arith.cmpi ne, %15, %c0_i32_6 : i32
    scf.if %16 {
      %c1_i32_18 = arith.constant 1 : i32
      %31 = arith.addi %arg1, %c1_i32_18 : i32
      %c1_i32_19 = arith.constant 1 : i32
      %32 = arith.subi %c1_i32_19, %9 : i32
      %c64_i32 = arith.constant 64 : i32
      %33 = arith.muli %31, %c64_i32 : i32
      %c512_i32 = arith.constant 512 : i32
      %34 = arith.addi %c512_i32, %33 : i32
      %35 = arith.index_cast %arg0 : i32 to index
      %36 = memref.load %arg2[%35] : memref<2xi32, #tpu.memory_space<smem>>
      %37 = arith.subi %34, %36 : i32
      %c0_i32_20 = arith.constant 0 : i32
      %c960_i32 = arith.constant 960 : i32
      %38 = arith.maxsi %c0_i32_20, %37 : i32
      %39 = arith.minsi %c960_i32, %38 : i32
      %c0_i32_21 = arith.constant 0 : i32
      %40 = tpu.memref_slice %arg4[%39, %c0_i32_21] : memref<1024x128xf32, #tpu.memory_space<any>> -> memref<64x128xf32, #tpu.memory_space<any>>
      %c0_i32_22 = arith.constant 0 : i32
      %c0_i32_23 = arith.constant 0 : i32
      %41 = tpu.memref_slice %arg6[%32, %c0_i32_22, %c0_i32_23] : memref<2x64x128xf32, #tpu.memory_space<vmem>> -> memref<1x64x128xf32, #tpu.memory_space<vmem>>
      %42 = tpu.memref_squeeze %41 : memref<1x64x128xf32, #tpu.memory_space<vmem>> -> memref<64x128xf32, #tpu.memory_space<vmem>>
      %43 = tpu.memref_slice %arg7[%32] : memref<2x!tpu.dma_semaphore, #tpu.memory_space<semaphore_mem>> -> memref<1x!tpu.dma_semaphore, #tpu.memory_space<semaphore_mem>>
      %44 = tpu.memref_squeeze %43 : memref<1x!tpu.dma_semaphore, #tpu.memory_space<semaphore_mem>> -> memref<!tpu.dma_semaphore, #tpu.memory_space<semaphore_mem>>
      tpu.enqueue_dma source(%40 : memref<64x128xf32, #tpu.memory_space<any>>) target(%42 : memref<64x128xf32, #tpu.memory_space<vmem>>) target_semaphore(%44 : memref<!tpu.dma_semaphore, #tpu.memory_space<semaphore_mem>>)
    } else {
    }
    %c0_i32_7 = arith.constant 0 : i32
    %c0_i32_8 = arith.constant 0 : i32
    %17 = tpu.memref_slice %arg4[%c0_i32_7, %c0_i32_8] : memref<1024x128xf32, #tpu.memory_space<any>> -> memref<64x128xf32, #tpu.memory_space<any>>
    %c0_i32_9 = arith.constant 0 : i32
    %c0_i32_10 = arith.constant 0 : i32
    %18 = tpu.memref_slice %arg6[%9, %c0_i32_9, %c0_i32_10] : memref<2x64x128xf32, #tpu.memory_space<vmem>> -> memref<1x64x128xf32, #tpu.memory_space<vmem>>
    %19 = tpu.memref_squeeze %18 : memref<1x64x128xf32, #tpu.memory_space<vmem>> -> memref<64x128xf32, #tpu.memory_space<vmem>>
    %20 = tpu.memref_slice %arg7[%9] : memref<2x!tpu.dma_semaphore, #tpu.memory_space<semaphore_mem>> -> memref<1x!tpu.dma_semaphore, #tpu.memory_space<semaphore_mem>>
    %21 = tpu.memref_squeeze %20 : memref<1x!tpu.dma_semaphore, #tpu.memory_space<semaphore_mem>> -> memref<!tpu.dma_semaphore, #tpu.memory_space<semaphore_mem>>
    tpu.wait_dma2 semaphore(%21 : memref<!tpu.dma_semaphore, #tpu.memory_space<semaphore_mem>>) src(%17 : memref<64x128xf32, #tpu.memory_space<any>>) dst(%19 : memref<64x128xf32, #tpu.memory_space<vmem>>)
    %c0 = arith.constant 0 : index
    %c0_11 = arith.constant 0 : index
    %c0_12 = arith.constant 0 : index
    %22 = vector.load %arg3[%c0, %c0_11, %c0_12] : memref<1x64x128xf32, #tpu.memory_space<vmem>>, vector<1x64x128xf32>
    %23 = vector.shape_cast %22 : vector<1x64x128xf32> to vector<64x128xf32>
    %24 = arith.index_cast %9 : i32 to index
    %c0_13 = arith.constant 0 : index
    %c0_14 = arith.constant 0 : index
    %25 = vector.load %arg6[%24, %c0_13, %c0_14] : memref<2x64x128xf32, #tpu.memory_space<vmem>>, vector<1x64x128xf32>
    %26 = vector.shape_cast %25 : vector<1x64x128xf32> to vector<64x128xf32>
    %27 = arith.addf %23, %26 : vector<64x128xf32>
    %c0_15 = arith.constant 0 : index
    %c0_16 = arith.constant 0 : index
    %c0_17 = arith.constant 0 : index
    %28 = vector.load %arg5[%c0_15, %c0_16, %c0_17] : memref<1x64x128xf32, #tpu.memory_space<vmem>>, vector<1x64x128xf32>
    %29 = vector.shape_cast %28 : vector<1x64x128xf32> to vector<64x128xf32>
    %30 = vector.shape_cast %27 : vector<64x128xf32> to vector<1x64x128xf32>
    tpu.vector_store %arg5[%c0_15, %c0_16, %c0_17], %30 {strides = array<i32>} : memref<1x64x128xf32, #tpu.memory_space<vmem>>, vector<1x64x128xf32>,
    return
  }
  func.func @transform_0(%arg0: i32, %arg1: i32, %arg2: memref<2xi32, #tpu.memory_space<smem>>) -> (i32, i32, i32) {
    %c0_i32 = arith.constant 0 : i32
    %c0_i32_0 = arith.constant 0 : i32
    return %arg0, %arg1, %c0_i32 : i32, i32, i32
  }
  func.func @transform_2(%arg0: i32, %arg1: i32, %arg2: memref<2xi32, #tpu.memory_space<smem>>) -> (i32, i32, i32) {
    %c0_i32 = arith.constant 0 : i32
    %c0_i32_0 = arith.constant 0 : i32
    return %arg0, %arg1, %c0_i32 : i32, i32, i32
  }
}

</mosaic_0001>

<bundles_post_ra>
// kernel: tpu_custom_call.1
= control target key start
LH: loop header
LB: loop body
LE: loop exit
PB: predicated region body
PF: predicated region fallthrough
CT: control target
= control target key end

     0   :  { %s1094_s0 = inlined_call_operand.hbm [shape: s32[2], index: 0, kind: input, shape index: {}]   ;;  %s1095_s1 = inlined_call_operand.hbm [shape: f32[2,256,128], index: 1, kind: input, shape index: {}]   ;;  %s1096_s2 = inlined_call_operand.hbm [shape: f32[1024,128], index: 2, kind: input, shape index: {}]   ;;  %s1097_s3 = inlined_call_operand.hbm [shape: f32[2,256,128], index: 3, kind: output, shape index: {}]  }
   0x1   :  { %1106 = sst [smem:[#allocation26_spill]] %s1095_s1  ;;  %s532_s14 = scalar_lea.hbm %s1094_s0, 16 }
   0x2   :  { %p533_p0 = scmp.ne.s32.totalorder %s1094_s0, %s532_s14  ;;  %p536_p1 = scmp.lt.u32.totalorder %s532_s14, %s1094_s0 }
   0x4   :  { %p538_p2 = pnand %p536_p1, %p533_p0 }
   0x6   :  { %541 = shalt.err (!%p538_p2)  }
   0x7   :  { %s732_s19 = smov [#allocation5]  }
   0x8   :  { %9 = dma.hbm_to_smem %s1094_s0, 16, %s732_s19, [#allocation4] }
   0x9   :  { %688 = dma.done.wait [#allocation4], 16 }
   0xa   :  { %689 = vsyncadd [#allocation4], 4294967280 }
   0xb   :  { %11 = sfence }
   0xc   :  { %12 = vsyncpa [#allocation7], 0 }
   0xd   :  { %14 = vsyncpa [#allocation7 + $0x1], 0 }
   0xe   :  { %15 = vsyncpa [#allocation8], 0 }
   0xf   :  { %17 = vsyncpa [#allocation8 + $0x1], 0  ;;  %s772_s22 = smov 0   ;;  %s774_s23 = smov 0  }
  0x10   :  { %s776_s24 = smov 0   ;;  %s778_s25 = smov 0  }
  0x11   :  { %s780_s26 = smov 0   ;;  %s782_s27 = smov 0  }
  0x12   :  { %s784_s0 = smov 0   ;;  %s786_s28 = smov 0  }
  0x13 LB: > { %1107 = sst [smem:[#allocation22_spill]] %s722_s27  ;;  %s393_s29 = sadd.s32 4294967295, %s730_s28   ;;  %s730_s28 = sphi %s786_s28, %s23_s28   ;;  %s726_s0 = sphi %s784_s0, %s1128_s0   ;;  %s722_s27 = sphi %s782_s27, %s1127_s27   ;;  %s718_s26 = sphi %s780_s26, %s1126_s26   ;;  %s714_s25 = sphi %s778_s25, %s1125_s25   ;;  %s710_s24 = sphi %s776_s24, %s1131_s24   ;;  %s706_s23 = sphi %s774_s23, %s1130_s23   ;;  %s702_s22 = sphi %s772_s22, %s1129_s22  }
  0x14   : > { %1108 = sst [smem:[#allocation23_spill]] %s726_s0  ;;  %s394_s30 = sadd.s32 4294967294, %s730_s28  }
  0x15   : > { %s32_s4 = sadd.s32 1, %s722_s27  ;;  %s35_s5 = sadd.s32 1, %s726_s0 }
  0x16   : > { %p33_p3 = scmp.ge.s32.totalorder %s32_s4, 4  ;;  %s44_s6 = sadd.s32 1, %s710_s24 }
  0x17   : > { %p51_p4 = scmp.ne.s32.totalorder %s710_s24, %s706_s23  ;;  %p52_p5 = scmp.eq.s32.totalorder %s730_s28, 0 }
  0x18   : > { %s1133_s4 = smov (%p33_p3, %s32_s4), 0  ;;  %s1135_s5 = smov (!%p33_p3, %s35_s5), %s726_s0 }
  0x19   : > { %1109 = sst [smem:[#allocation24_spill]] %s1133_s4  ;;  %s40_s7 = ssub.s32 %s722_s27, %s1133_s4 }
  0x1a   : > { %p825_p6 = por %p52_p5, %p51_p4  ;;  %p37_p7 = scmp.ge.s32.totalorder %s1135_s5, 2 }
  0x1b   : > { %p57_p8 = scmp.ne.s32.totalorder %s706_s23, %s702_s22  ;;  %p58_p9 = scmp.eq.s32.totalorder %s393_s29, 0 }
  0x1c   : > { %p83_p10 = scmp.eq.s32.totalorder %s393_s29, 7  ;;  %s1137_s5 = smov (%p37_p7, %s1135_s5), 0 }
  0x1d   : > { %1111 = sst [smem:[#allocation25_spill]] %s1137_s5  ;;  %p833_p11 = por %p58_p9, %p57_p8 }
  0x1e   : > { %p837_p12 = por %p83_p10, %p51_p4  ;;  %s39_s11 = ssub.s32 %s726_s0, %s1137_s5 }
  0x1f   : > { %p89_p13 = scmp.eq.s32.totalorder %s394_s30, 7  ;;  %s41_s12 = sor.u32 %s40_s7, %s39_s11 }
  0x20   : > { %s1113_s10 = scalar_select %p837_p12, 1, 0 }
  0x21   : > { %p42_p0 = scmp.eq.s32.totalorder %s41_s12, 0  ;;  %p843_p1 = por %p89_p13, %p57_p8 }
  0x22   : > { %p458_p2 = scmp.lt.s32.totalorder %s730_s28, 8  ;;  %s109_s14 = sand.u32 1, %s710_s24  }
  0x23   : > { %s1114_s13 = scalar_select %p843_p1, 1, 0 }
  0x24   : > { %s850_s15 = scalar_select %p42_p0, %s710_s24, %s44_s6  }
  0x25   : > { %s397_s16 = sshll.u32 %s109_s14, 6  ;;  %s398_s17 = sshll.u32 %s722_s27, 3 }
  0x26   : > { %s399_s18 = sshll.u32 %s726_s0, 5  ;;  %s113_s19 = scalar_lea.vmem [#allocation6], %s397_s16 }
  0x27   : > { %s122_s20 = sshll.u32 %s113_s19, 4  ;;  %s119_s21 = sadd.s32 %s399_s18, %s398_s17  ;;  %s854_s20 = int_to_ptr.vmem [resolvable:$true] %s122_s20 }
  0x28   : > { %s400_s29 = sshll.u32 %s119_s21, 7  ;;  %p858_p3 = pnand %p458_p2, %p825_p6 }
  0x29   : > { %s1116_s1 = sld [smem:[#allocation26_spill]]  ;;  %s867_s12 = scalar_lea.sflag [#allocation7], %s109_s14 }
  0x2a   : > { %p544_p5 = pneg %p858_p3 }
  0x2f   : > { %s865_s6 = scalar_lea.hbm %s1116_s1, %s400_s29  ;;  %s547_s18 = scalar_lea.hbm %s1116_s1, 8192 }
  0x30   : > { %s542_s16 = scalar_lea.hbm %s865_s6, 1024  ;;  %p548_p8 = scmp.lt.u32.totalorder %s865_s6, %s1116_s1 }
  0x31   : > { %p543_p4 = scmp.ne.s32.totalorder %s865_s6, %s542_s16  ;;  %p549_p9 = scmp.lt.u32.totalorder %s547_s18, %s542_s16 }
  0x32   : > { %p551_p13 = scmp.lt.u32.totalorder %s542_s16, %s865_s6 }
  0x33   : > { %p545_p6 = pnand %p544_p5, %p543_p4  ;;  %p550_p10 = por %p549_p9, %p548_p8 }
  0x35   : > { %p546_p7 = pneg %p545_p6  ;;  %p552_p0 = por %p551_p13, %p550_p10 }
  0x37   : > { %p553_p2 = pnand %p552_p0, %p546_p7 }
  0x39   : > { %556 = shalt.err (!%p553_p2)
}
  0x3a   : > { %s557_s14 = scalar_lea.vmem %s854_s20, 1024  ;;  %s733_s29 = smov [#allocation6]  }
  0x3b   : > { %p558_p4 = scmp.ne.s32.totalorder %s854_s20, %s557_s14  ;;  %s562_s7 = sshll.u32 %s733_s29, 4  ;;  %s563_s7 = int_to_ptr.vmem [resolvable:$false] %s562_s7 }
  0x3c   : > { %s564_s11 = scalar_lea.vmem %s563_s7, 2048  ;;  %p565_p12 = scmp.lt.s32.totalorder %s854_s20, %s563_s7 }
  0x3d   : > { %p560_p6 = pnand %p558_p4, %p544_p5  ;;  %p566_p8 = scmp.lt.s32.totalorder %s564_s11, %s557_s14 }
  0x3f   : > { %p561_p1 = pneg %p560_p6  ;;  %p567_p9 = por %p566_p8, %p565_p12 }
  0x41   : > { %p568_p10 = pnand %p567_p9, %p561_p1 }
  0x43   : > { %571 = shalt.err (!%p568_p10)
}
  0x44   : > { %s734_s16 = smov 128   ;;  %s735_s8 = smov 8  }
  0x45   : > { %453 = dma.hbm_to_vmem [thread:$0]  (!%p858_p3), %s865_s6, 1024, %s854_s20, %s867_s12, %s734_s16, %s734_s16, %s735_s8  }
  0x46   : > { %p401_p5 = scmp.ge.s32.totalorder %s730_s28, 1  ;;  %p130_p7 = scmp.lt.s32.totalorder %s730_s28, 9 }
  0x48   : > { %p131_p13 = pnand %p401_p5, %p130_p7 }
  0x49   : > { %s898_s17 = sand.u32 (!%p131_p13), 1, %s706_s23  }
  0x4a   : > { %134 = sbr.rel (%p131_p13) target bundleno = 182 (0xb6), region = 24  ;;  %s1099_s18 = sshll.u32 (!%p131_p13), %s898_s17, 6 }
  0x4b   : > { %s137_s19 = scalar_lea.sflag (!%p131_p13), [#allocation7], %s898_s17  ;;  %s904_s21 = scalar_lea.vmem (!%p131_p13), [#allocation6], %s1099_s18 }
  0x51   : > { %691 = dma.done.wait (%p833_p11), %s137_s19, 1024  }
  0x52   : > { %693 = vsyncadd (%p833_p11), %s137_s19, 4294966272  ;;  %p459_p12 = scmp.eq.s32.totalorder %s714_s25, 0  ;;  %s196_s20 = sadd.s32 1, %s714_s25 }
  0x53   : > { %p912_p1 = scmp.lt.s32.totalorder %s196_s20, 4  ;;  %s434_s12 = sshll.u32 %s714_s25, 6 }
  0x54   : > { %s441_s6 = scalar_select %p459_p12, [#allocation5], [#allocation16] }
  0x55   : > { %s442_s9 = scalar_select %p459_p12, %s718_s26, 0 }
  0x56   : > { %s435_s29 = sadd.s32 64, %s434_s12  ;;  %s736_s20 = smov [#allocation2]  }
  0x57   : > { %s177_s14 = sld [smem:[%s441_s6 + %s442_s9]]  ;;  %s203_s19 = sadd.s32 512, %s435_s29 }
  0x58   : > { %s445_s7 = scalar_select %p912_p1, [#allocation5], [#allocation17] }
  0x59   : > { %s446_s11 = scalar_select %p912_p1, %s718_s26, 0 }
  0x5a   : > { %s192_s18 = sshll.u32 %s736_s20, 4  ;;  %s162_s1 = ssub.s32 0, %s714_s25  ;;  %s930_s18 = int_to_ptr.vmem [resolvable:$true] %s192_s18 }
  0x5b   : > { %s204_s16 = sld [smem:[%s445_s7 + %s446_s11]]  ;;  %p161_p0 = scmp.lt.s32.totalorder %s714_s25, 0 }
  0x5c   : > { %s404_s5 = smin.u32 %s714_s25, %s162_s1 }
  0x5d   : > { %s178_s8 = ssub.s32 512, %s177_s14  ;;  %s164_s6 = sand.u32 1, %s404_s5  }
  0x5e   : > { %p179_p11 = scmp.gt.s32.totalorder %s178_s8, 0  ;;  %p408_p3 = scmp.lt.s32.totalorder %s178_s8, 960 }
  0x5f   : > { %s165_s12 = ssub.s32 0, %s164_s6 }
  0x60   : > { %s1139_s8 = smov (!%p179_p11, %s178_s8), 0  ;;  %s1143_s12 = smov (!%p161_p0, %s165_s12), %s164_s6 }
  0x61   : > { %s932_s9 = ssub.s32 %s203_s19, %s204_s16  ;;  %s1141_s8 = smov (!%p408_p3, %s1139_s8), 960 }
  0x62   : > { %s413_s14 = sshll.u32 %s1141_s8, 4  ;;  %p406_p4 = scmp.lt.s32.totalorder %s1143_s12, 0 }
  0x63   : > { %s184_s11 = scalar_lea.hbm %s1096_s2, %s413_s14  ;;  %s1103_s16 = scalar_lea.hbm %s1096_s2, 16384 }
  0x64   : > { %s572_s20 = scalar_lea.hbm %s184_s11, 1024  ;;  %p577_p10 = scmp.lt.u32.totalorder %s184_s11, %s1096_s2 }
  0x65   : > { %p573_p6 = scmp.ne.s32.totalorder %s184_s11, %s572_s20  ;;  %p578_p5 = scmp.lt.u32.totalorder %s1103_s16, %s572_s20 }
  0x66   : > { %p580_p13 = scmp.lt.u32.totalorder %s572_s20, %s184_s11 }
  0x67   : > { %p574_p8 = pnand %p573_p6, %p459_p12  ;;  %p579_p7 = por %p578_p5, %p577_p10 }
  0x69   : > { %p575_p9 = pneg %p574_p8  ;;  %p581_p11 = por %p580_p13, %p579_p7 }
  0x6b   : > { %p582_p3 = pnand %p581_p11, %p575_p9 }
  0x6d   : > { %585 = shalt.err (!%p582_p3)  }
  0x6e   : > { %s586_s14 = scalar_lea.vmem %s930_s18, 1024  ;;  %s1102_s29 = scalar_lea.vmem %s930_s18, 2048 }
  0x6f   : > { %p587_p0 = scmp.ne.s32.totalorder %s930_s18, %s586_s14  ;;  %p593_p2 = scmp.lt.s32.totalorder %s930_s18, %s930_s18 }
  0x70   : > { %p594_p10 = scmp.lt.s32.totalorder %s1102_s29, %s586_s14 }
  0x71   : > { %p588_p6 = pnand %p587_p0, %p459_p12 }
  0x72   : > { %p595_p5 = por %p594_p10, %p593_p2 }
  0x73   : > { %p589_p8 = pneg %p588_p6 }
  0x75   : > { %p596_p7 = pnand %p595_p5, %p589_p8 }
  0x77   : > { %599 = shalt.err (!%p596_p7)  }
  0x78   : > { %443 = dma.hbm_to_vmem [thread:$0]  (%p459_p12), %s184_s11, 1024, %s930_s18, [#allocation3] }
  0x79   : > { %s171_s4 = sadd.s32 2, %s1143_s12  ;;  %p416_p9 = scmp.lt.s32.totalorder %s932_s9, 960 }
  0x7a   : > { %s1145_s4 = smov (!%p406_p4, %s171_s4), %s1143_s12  ;;  %p1118_p13 = scmp.gt.s32.totalorder %s932_s9, 0 }
  0x7b   : > { %s201_s7 = ssub.s32 1, %s1145_s4 }
  0x7c   : > { %s1147_s9 = smov (!%p1118_p13, %s932_s9), 0  ;;  %s422_s1 = sshll.u32 %s201_s7, 6 }
  0x7d   : > { %s1149_s9 = smov (!%p416_p9, %s1147_s9), 960  ;;  %s213_s11 = scalar_lea.vmem [#allocation2], %s422_s1 }
  0x7e   : > { %s421_s5 = sshll.u32 %s1149_s9, 4  ;;  %s222_s14 = sshll.u32 %s213_s11, 4  ;;  %s223_s14 = int_to_ptr.vmem [resolvable:$true] %s222_s14 }
  0x7f   : > { %s211_s8 = scalar_lea.hbm %s1096_s2, %s421_s5  ;;  %s214_s29 = scalar_lea.sflag [#allocation3], %s201_s7 }
  0x80   : > { %s600_s16 = scalar_lea.hbm %s211_s8, 1024  ;;  %p605_p11 = scmp.lt.u32.totalorder %s211_s8, %s1096_s2 }
  0x81   : > { %p601_p12 = scmp.ne.s32.totalorder %s211_s8, %s600_s16  ;;  %s1119_s9 = scalar_lea.hbm %s1096_s2, 16384 }
  0x82   : > { %p606_p3 = scmp.lt.u32.totalorder %s1119_s9, %s600_s16  ;;  %p608_p6 = scmp.lt.u32.totalorder %s600_s16, %s211_s8 }
  0x83   : > { %p602_p2 = pnand %p601_p12, %p912_p1 }
  0x84   : > { %p607_p0 = por %p606_p3, %p605_p11 }
  0x85   : > { %p603_p4 = pneg %p602_p2 }
  0x86   : > { %p609_p8 = por %p608_p6, %p607_p0 }
  0x88   : > { %p610_p10 = pnand %p609_p8, %p603_p4 }
  0x8a   : > { %613 = shalt.err (!%p610_p10)  }
  0x8b   : > { %s614_s7 = scalar_lea.vmem %s223_s14, 1024  ;;  %p621_p13 = scmp.lt.s32.totalorder %s223_s14, %s930_s18 }
  0x8c   : > { %p615_p5 = scmp.ne.s32.totalorder %s223_s14, %s614_s7  ;;  %s1120_s0 = scalar_lea.vmem %s930_s18, 2048 }
  0x8d   : > { %p622_p12 = scmp.lt.s32.totalorder %s1120_s0, %s614_s7 }
  0x8e   : > { %p616_p7 = pnand %p615_p5, %p912_p1 }
  0x8f   : > { %p623_p2 = por %p622_p12, %p621_p13 }
  0x90   : > { %p617_p9 = pneg %p616_p7 }
  0x92   : > { %p624_p3 = pnand %p623_p2, %p617_p9 }
  0x94   : > { %627 = shalt.err (!%p624_p3)  }
  0x95   : > { %447 = dma.hbm_to_vmem [thread:$0]  (%p912_p1), %s211_s8, 1024, %s223_s14, %s214_s29 }
  0x96   : > { %s1121_s27 = sshll.u32 %s898_s17, 6  ;;  %s1122_s20 = sshll.u32 %s1145_s4, 6 }
  0x97   : > { %s998_s16 = scalar_lea.vmem [#allocation9], %s1121_s27  ;;  %s1002_s1 = scalar_lea.vmem [#allocation2], %s1122_s20 }
  0x98   : > { %s228_s5 = scalar_lea.sflag [#allocation3], %s1145_s4 }
  0x99   : > { %694 = dma.done.wait %s228_s5, 1024 }
  0x9a   : > { %695 = vsyncadd %s228_s5, 4294966272  ;;  %s425_s18 = sshll.u32 %s714_s25, 3  ;;  %s426_s30 = sshll.u32 %s718_s26, 5  ;;  %v232_v0 = vld [vmem:[%s904_s21] sm:$0xff]  ;;  %v233_v2 = vld [vmem:[%s904_s21 + $0x8] sm:$0xff] }
  0x9b   : > { %v240_v1 = vld [vmem:[%s1002_s1] sm:$0xff]  ;;  %s1010_s29 = sadd.s32 %s426_s30, %s425_s18  ;;  %v241_v4 = vld [vmem:[%s1002_s1 + $0x8] sm:$0xff]  ;;  %v234_v5 = vld [vmem:[%s904_s21 + $0x10] sm:$0xff]  ;;  %s280_s25 = sshll.u32 %s998_s16, 4  ;;  %s1031_s25 = int_to_ptr.vmem [resolvable:$true] %s280_s25 }
  0x9c   : > { %v248_v3 = vadd.f32 %v240_v1, %v232_v0  ;;  %v242_v6 = vld [vmem:[%s1002_s1 + $0x10] sm:$0xff]  ;;  %v249_v7 = vadd.f32 %v241_v4, %v233_v2  ;;  %v235_v9 = vld [vmem:[%s904_s21 + $0x18] sm:$0xff]  ;;  %v236_v11 = vld [vmem:[%s904_s21 + $0x20] sm:$0xff]  ;;  %s427_s26 = sshll.u32 %s1010_s29, 7  ;;  %s265_s8 = scalar_lea.sflag [#allocation8], %s898_s17 }
  0x9d   : > { %v250_v8 = vadd.f32 %v242_v6, %v234_v5  ;;  %v243_v10 = vld [vmem:[%s1002_s1 + $0x18] sm:$0xff]  ;;  %v244_v13 = vld [vmem:[%s1002_s1 + $0x20] sm:$0xff]  ;;  %v237_v14 = vld [vmem:[%s904_s21 + $0x28] sm:$0xff]  ;;  %s1038_s6 = scalar_lea.hbm %s1097_s3, %s427_s26  ;;  %p1123_p4 = scmp.ne.s32.totalorder %s1113_s10, 0 }
  0x9e   : > { %256 = vst [vmem:[%s998_s16] sm:$0xff] %v248_v3  ;;  %v251_v12 = vadd.f32 %v243_v10, %v235_v9  ;;  %v245_v15 = vld [vmem:[%s1002_s1 + $0x28] sm:$0xff]  ;;  %257 = vst [vmem:[%s998_s16 + $0x8] sm:$0xff] %v249_v7  ;;  %v252_v16 = vadd.f32 %v244_v13, %v236_v11  ;;  %v238_v18 = vld [vmem:[%s904_s21 + $0x30] sm:$0xff]  ;;  %s737_s11 = smov [#allocation9]  }
  0x9f   : > { %258 = vst [vmem:[%s998_s16 + $0x10] sm:$0xff] %v250_v8  ;;  %v253_v17 = vadd.f32 %v245_v15, %v237_v14  ;;  %v246_v19 = vld [vmem:[%s1002_s1 + $0x30] sm:$0xff]  ;;  %v239_v20 = vld [vmem:[%s904_s21 + $0x38] sm:$0xff]  ;;  %s628_s21 = scalar_lea.vmem %s1031_s25, 1024  ;;  %s632_s14 = sshll.u32 %s737_s11, 4  ;;  %s633_s14 = int_to_ptr.vmem [resolvable:$false] %s632_s14 }
  0xa0   : > { %259 = vst [vmem:[%s998_s16 + $0x18] sm:$0xff] %v251_v12  ;;  %v254_v21 = vadd.f32 %v246_v19, %v238_v18  ;;  %v247_v22 = vld [vmem:[%s1002_s1 + $0x38] sm:$0xff]  ;;  %260 = vst [vmem:[%s998_s16 + $0x20] sm:$0xff] %v252_v16  ;;  %p629_p1 = scmp.ne.s32.totalorder %s1031_s25, %s628_s21  ;;  %s634_s12 = scalar_lea.vmem %s633_s14, 2048 }
  0xa1   : > { %261 = vst [vmem:[%s998_s16 + $0x28] sm:$0xff] %v253_v17  ;;  %v255_v23 = vadd.f32 %v247_v22, %v239_v20  ;;  %p635_p6 = scmp.lt.s32.totalorder %s1031_s25, %s633_s14  ;;  %p636_p8 = scmp.lt.s32.totalorder %s634_s12, %s628_s21 }
  0xa2   : > { %262 = vst [vmem:[%s998_s16 + $0x30] sm:$0xff] %v254_v21  ;;  %p630_p11 = pnand %p629_p1, %p1123_p4 }
  0xa3   : > { %263 = vst [vmem:[%s998_s16 + $0x38] sm:$0xff] %v255_v23  ;;  %p637_p10 = por %p636_p8, %p635_p6 }
  0xa4   : > { %p631_p0 = pneg %p630_p11 }
  0xa6   : > { %p638_p5 = pnand %p637_p10, %p631_p0 }
  0xa8   : > { %641 = shalt.err (!%p638_p5)
}
  0xa9   : > { %s642_s9 = scalar_lea.hbm %s1038_s6, 1024  ;;  %s646_s27 = scalar_lea.hbm %s1097_s3, 8192 }
  0xaa   : > { %p643_p7 = scmp.ne.s32.totalorder %s1038_s6, %s642_s9  ;;  %p647_p12 = scmp.lt.u32.totalorder %s1038_s6, %s1097_s3 }
  0xab   : > { %p648_p2 = scmp.lt.u32.totalorder %s646_s27, %s642_s9  ;;  %p650_p1 = scmp.lt.u32.totalorder %s642_s9, %s1038_s6 }
  0xac   : > { %p644_p9 = pnand %p643_p7, %p1123_p4 }
  0xad   : > { %p649_p3 = por %p648_p2, %p647_p12 }
  0xae   : > { %p645_p13 = pneg %p644_p9 }
  0xaf   : > { %p651_p11 = por %p650_p1, %p649_p3 }
  0xb1   : > { %p652_p0 = pnand %p651_p11, %p645_p13 }
  0xb3   : > { %655 = shalt.err (!%p652_p0)
}
  0xb4   : > { %s738_s1 = smov 128   ;;  %s739_s5 = smov 8  }
  0xb5   : > { %448 = dma.vmem_to_hbm [thread:$0]  (%p1123_p4), %s1031_s25, 1024, %s1038_s6, %s265_s8, %s738_s1, %s738_s1, %s739_s5  }
  0xb6 PF: > { %p461_p6 = scmp.ge.s32.totalorder %s730_s28, 2  ;;  %s295_s18 = sand.u32 1, %s702_s22  }
  0xb7   : > { %p1124_p8 = scmp.ne.s32.totalorder %s1114_s13, 0  ;;  %s296_s30 = scalar_lea.sflag [#allocation8], %s295_s18 }
  0xb9   : > { %p455_p10 = pnand %p461_p6, %p1124_p8 }
  0xbb   : > { %697 = dma.done.wait (!%p455_p10), %s296_s30, 1024  }
  0xbc   : > { %699 = vsyncadd (!%p455_p10), %s296_s30, 4294966272  ;;  %s23_s28 = sadd.s32 1, %s730_s28   ;;  %s1125_s25 = sld [smem:[#allocation22_spill]] }
  0xbd   : > { %p20_p5 = scmp.ge.s32.totalorder %s23_s28, 10   ;;  %s1126_s26 = sld [smem:[#allocation23_spill]] }
  0xbe   : > { %s1127_s27 = sld [smem:[#allocation24_spill]]  ;;  %s1128_s0 = sld [smem:[#allocation25_spill]] }
  0xbf   : > { %s1129_s22 = smov %s706_s23  ;;  %s1130_s23 = smov %s710_s24 }
  0xc0   : > { %s1131_s24 = smov %s850_s15  ;;  %22 = sbr.rel (!%p20_p5) target bundleno = 19 (0x13), region = 92 }
  0xc7   :  { %301 = vsyncpa [#allocation7], 1 }
  0xc8   :  { %303 = vsyncpa [#allocation7 + $0x1], 1 }
  0xc9   :  { %304 = vsyncpa [#allocation8], 1 }
  0xca   :  { %306 = vsyncpa [#allocation8 + $0x1], 1 }
  0xcb   :  { %307 = vsyncmov [#allocation3] }
  0xce   :  { %s308_s10 = vpop.sfrf %307 }
  0xcf   :  { %p430_p4 = scmp.ne.s32.totalorder %s308_s10, 0 }
  0xd1   :  { %312 = shalt.err (%p430_p4)  }
  0xd2   :  { %314 = vsyncmov [#allocation3 + $0x1] }
  0xd5   :  { %s315_s13 = vpop.sfrf %314 }
  0xd6   :  { %p431_p7 = scmp.ne.s32.totalorder %s315_s13, 0 }
  0xd8   :  { %319 = shalt.err (%p431_p7)  }

</bundles_post_ra>
